<compile_context>
chip_gen: v7x
topology: tpu7x:2x2x1
jax: 0.10.0
libtpu: 0.0.40
codegen_flags: <defaults>
</compile_context>

<pallas_src>
import jax
import jax.numpy as jnp
import numpy as np
from jax.experimental import pallas as pl
from jax.experimental.pallas import tpu as pltpu


def _sdf_kernel(x_ref, w1_ref, w2_ref, b2_ref, w3_ref, b3_ref, out_ref):
    """One (batch, N-tile) grid step; all P parts are min-reduced inside the body.

    x_ref  : (1, 8, TN)    rows = [x, y, z, 1, 0, 0, 0, 0]            (VMEM, streamed)
    w1_ref : (1, P, H, 8)  [..., :3] = W1_eff^T, [..., 3] = b1_eff    (VMEM, resident)
    w2_ref : (H, H)        layer-2 weight, transposed                 (VMEM, resident)
    b2_ref : (H, 1)        layer-2 bias column                        (VMEM, resident)
    w3_ref : (H, 1)        layer-3 weight column                      (VMEM, resident)
    b3_ref : (1,)          layer-3 bias scalar                        (SMEM)
    out_ref: (1, 1, TN)    min_p sdf_p  (lane-dense store)
    """
    x = x_ref[0]          # (8, TN)
    w2 = w2_ref[...]      # (H, H)
    b2 = b2_ref[...]      # (H, 1)
    w3 = w3_ref[...]      # (H, 1)

    num_parts = w1_ref.shape[1]
    best = None
    for p in range(num_parts):            # static unroll; P is a small compile-time constant
        wp = w1_ref[0, p]                 # (H, 8) — static slice, no copy
        # Layer 1: transform + latent already folded into wp (MXU, K=8 sublane-aligned).
        h1 = jnp.maximum(jnp.dot(wp, x, preferred_element_type=jnp.float32), 0.0)
        # Layer 2 (MXU).
        h2 = jnp.maximum(
            jnp.dot(w2, h1, preferred_element_type=jnp.float32) + b2, 0.0)
        # Layer 3: output dim is 1 -> VPU multiply + sublane reduce instead of an M=1 MXU matmul.
        sdf_p = jnp.sum(h2 * w3, axis=0, keepdims=True)     # (1, TN)
        # combine_part_sdf (eval): running min kept in registers.
        best = sdf_p if best is None else jnp.minimum(best, sdf_p)

    # output_scale is None in this configuration -> no scaling.
    # TODO(synk): out_softmin / out_softmax (training-only) combine branches not implemented.
    out_ref[0] = best + b3_ref[0]


def sdfnet_forward(xyz, part_lat, R, t, s, params, *, tn=None):
    """Forward pass. Returns (B, N, 1) = min over parts of the per-part SDF."""
    B, N, _ = xyz.shape
    _, P, L = part_lat.shape
    H = params["w2"].shape[0]
    f32 = jnp.float32

    if tn is None:
        tn = N if N <= 1024 else 1024
    assert N % tn == 0 and (tn == N or tn % 128 == 0), (N, tn)

    w1x, w1l, b1 = params["w1x"], params["w1l"], params["b1"]

    # --- Fold inv_transform_parts + latent into layer 1 (cheap XLA precompute) ---
    # canonical = ((x - t) @ R) / s ;  z1 = canonical @ w1x + lat @ w1l + b1
    #   =>  z1 = x @ W1_eff + b1_eff   with
    #       W1_eff[k,h] = sum_j (R[k,j] / s[j]) * w1x[j,h]
    #       b1_eff[h]   = b1[h] + (lat @ w1l)[h] - sum_k t[k] * W1_eff[k,h]
    M = R.astype(f32) / s.astype(f32)[..., None, :]                       # (B,P,3,3)
    W1_eff = jnp.einsum("bpkj,jh->bpkh", M, w1x)                          # (B,P,3,H)
    b1_eff = (part_lat.astype(f32) @ w1l + b1
              - jnp.einsum("bpk,bpkh->bph", t.astype(f32), W1_eff))       # (B,P,H)
    # Augmented per-part (H, 8) layer-1 operator acting on rows [x,y,z,1,0,0,0,0]
    # (K padded 4 -> 8 so the contracting dim is a full f32 sublane group).
    w_aug = jnp.concatenate(
        [jnp.swapaxes(W1_eff, -1, -2), b1_eff[..., None],
         jnp.zeros((B, P, H, 4), f32)], axis=-1)                          # (B,P,H,8)

    # Transposed, augmented query points: (B, 8, N) so N fills the lane axis.
    x_aug = jnp.concatenate(
        [jnp.swapaxes(xyz.astype(f32), -1, -2),
         jnp.ones((B, 1, N), f32),
         jnp.zeros((B, 4, N), f32)], axis=1)                              # (B,8,N)

    # TODO(synk): on v6e/v7x, cast w_aug/w2T/x_aug to bf16 (keep f32 accumulation and
    # f32 min-combine) for ~2x MXU throughput; kept f32 here for exact numerics.
    w2T = jnp.swapaxes(params["w2"], 0, 1).astype(f32)                    # (H,H)
    b2c = params["b2"].reshape(H, 1).astype(f32)
    w3c = params["w3"].reshape(H, 1).astype(f32)
    b3s = params["b3"].reshape(1).astype(f32)

    out = pl.pallas_call(
        _sdf_kernel,
        out_shape=jax.ShapeDtypeStruct((B, 1, N), f32),
        grid_spec=pltpu.PrefetchScalarGridSpec(
            num_scalar_prefetch=0,
            grid=(B, N // tn),
            in_specs=[
                pl.BlockSpec((1, 8, tn), lambda b, n: (b, 0, n)),        # points (streamed)
                pl.BlockSpec((1, P, H, 8), lambda b, n: (b, 0, 0, 0)),   # folded layer-1, all parts
                pl.BlockSpec((H, H), lambda b, n: (0, 0)),               # w2^T
                pl.BlockSpec((H, 1), lambda b, n: (0, 0)),               # b2 column
                pl.BlockSpec((H, 1), lambda b, n: (0, 0)),               # w3 column
                pl.BlockSpec(memory_space=pltpu.MemorySpace.SMEM),       # b3 scalar
            ],
            out_specs=pl.BlockSpec((1, 1, tn), lambda b, n: (b, 0, n)),
        ),
        compiler_params=pltpu.CompilerParams(
            # No reduction axis in the grid (parts are reduced in-body), so both axes
            # are parallel -> megacore / 2-TC sharding even when B == 1.
            dimension_semantics=("parallel", "parallel")),
    )(x_aug, w_aug, w2T, b2c, w3c, b3s)

    # (B,1,N) and (B,N,1) share the same row-major layout; this reshape is free.
    return out.reshape(B, N, 1)


def sdfnet_ref(xyz, part_lat, R, t, s, params):
    """Pure-JAX reference of the same forward pass (un-folded formulation)."""
    B, N, _ = xyz.shape
    _, P, L = part_lat.shape
    x = xyz[:, :, None, :]                                   # (B, N, 1, 3)  (unsqueeze(-2))
    d = x - t[:, None, :, :]                                 # (B, N, P, 3)
    local = jnp.einsum("bnpk,bpkj->bnpj", d, R) / s[:, None, :, :]
    lat = jnp.broadcast_to(part_lat[:, None, :, :], (B, N, P, L))
    z1 = local @ params["w1x"] + lat @ params["w1l"] + params["b1"]
    h1 = jnp.maximum(z1, 0.0)
    h2 = jnp.maximum(h1 @ params["w2"] + params["b2"], 0.0)
    sdf = h2 @ params["w3"] + params["b3"]                   # (B, N, P, 1)
    return jnp.min(sdf, axis=-2)                             # (B, N, 1)


if __name__ == "__main__":
    B, N, P, L, H = 2, 256, 4, 16, 32
    key = jax.random.PRNGKey(0)
    keys = jax.random.split(key, 10)

    xyz = jax.random.normal(keys[0], (B, N, 3), jnp.float32)
    part_lat = 0.5 * jax.random.normal(keys[1], (B, P, L), jnp.float32)
    Rm, _ = jnp.linalg.qr(jax.random.normal(keys[2], (B, P, 3, 3), jnp.float32))
    Rm = Rm.astype(jnp.float32)
    t = 0.1 * jax.random.normal(keys[3], (B, P, 3), jnp.float32)
    s = jax.random.uniform(keys[4], (B, P, 3), jnp.float32, minval=0.5, maxval=1.5)

    def linear(k, fin, fout):
        lim = 1.0 / np.sqrt(fin)
        kw, kb = jax.random.split(k)
        w = jax.random.uniform(kw, (fin, fout), jnp.float32, -lim, lim)
        b = jax.random.uniform(kb, (1, fout), jnp.float32, -lim, lim)
        return w, b

    w1, b1 = linear(keys[5], L + 3, H)   # input = concat(part_lat, feats)
    w2, b2 = linear(keys[6], H, H)
    w3, b3 = linear(keys[7], H, 1)
    params = dict(w1l=w1[:L], w1x=w1[L:], b1=b1, w2=w2, b2=b2, w3=w3, b3=b3)

    out = sdfnet_forward(xyz, part_lat, Rm, t, s, params, tn=128)
    out = jax.block_until_ready(out)

    ref = sdfnet_ref(xyz, part_lat, Rm, t, s, params)
    np.testing.assert_allclose(np.asarray(out), np.asarray(ref), rtol=1e-3, atol=1e-3)

    print("KERNEL_OK")
</pallas_src>

<mosaic_0001>
module attributes {stable_mosaic.version = 11 : i64} {
  func.func @_sdf_kernel(%arg0: i32, %arg1: i32, %arg2: memref<1x8x128xf32, #tpu.memory_space<vmem>>, %arg3: memref<1x4x32x8xf32, #tpu.memory_space<vmem>>, %arg4: memref<32x32xf32, #tpu.memory_space<vmem>>, %arg5: memref<32x1xf32, #tpu.memory_space<vmem>>, %arg6: memref<32x1xf32, #tpu.memory_space<vmem>>, %arg7: memref<1xf32, #tpu.memory_space<smem>>, %arg8: memref<1x1x128xf32, #tpu.memory_space<vmem>>) attributes {dimension_semantics = [#tpu.dimension_semantics<parallel>, #tpu.dimension_semantics<parallel>], iteration_bounds = array<i64: 2, 2>, scalar_prefetch = 0 : i64, scratch_operands = 0 : i64, tpu.core_type = #tpu.core_type<tc>, window_params = [{transform_indices = @transform_0, window_bounds = array<i64: 1, 8, 128>}, {transform_indices = @transform_1, window_bounds = array<i64: 1, 4, 32, 8>}, {pipeline_mode = #tpu.pipeline_mode<synchronous>, transform_indices = @transform_2, window_bounds = array<i64: 32, 32>}, {pipeline_mode = #tpu.pipeline_mode<synchronous>, transform_indices = @transform_3, window_bounds = array<i64: 32, 1>}, {pipeline_mode = #tpu.pipeline_mode<synchronous>, transform_indices = @transform_4, window_bounds = array<i64: 32, 1>}, {transform_indices = @transform_5, window_bounds = array<i64: 1>}, {transform_indices = @transform_6, window_bounds = array<i64: 1, 1, 128>}]} {
    %c0 = arith.constant 0 : index
    %c0_0 = arith.constant 0 : index
    %c0_1 = arith.constant 0 : index
    %0 = vector.load %arg2[%c0, %c0_0, %c0_1] : memref<1x8x128xf32, #tpu.memory_space<vmem>>, vector<1x8x128xf32>
    %1 = vector.shape_cast %0 : vector<1x8x128xf32> to vector<8x128xf32>
    %c0_2 = arith.constant 0 : index
    %c0_3 = arith.constant 0 : index
    %2 = vector.load %arg4[%c0_2, %c0_3] : memref<32x32xf32, #tpu.memory_space<vmem>>, vector<32x32xf32>
    %c0_4 = arith.constant 0 : index
    %c0_5 = arith.constant 0 : index
    %3 = vector.load %arg5[%c0_4, %c0_5] : memref<32x1xf32, #tpu.memory_space<vmem>>, vector<32x1xf32>
    %c0_6 = arith.constant 0 : index
    %c0_7 = arith.constant 0 : index
    %4 = vector.load %arg6[%c0_6, %c0_7] : memref<32x1xf32, #tpu.memory_space<vmem>>, vector<32x1xf32>
    %c0_8 = arith.constant 0 : index
    %c0_9 = arith.constant 0 : index
    %c0_10 = arith.constant 0 : index
    %c0_11 = arith.constant 0 : index
    %5 = vector.load %arg3[%c0_8, %c0_9, %c0_10, %c0_11] : memref<1x4x32x8xf32, #tpu.memory_space<vmem>>, vector<1x1x32x8xf32>
    %6 = vector.shape_cast %5 : vector<1x1x32x8xf32> to vector<32x8xf32>
    %cst = arith.constant dense<0.000000e+00> : vector<32x128xf32>
    %7 = tpu.matmul %6, %1, %cst {dimension_numbers = #tpu.dot_dimension_numbers<[1], [0], [0], [1], [0, 0, 1, 1], [], []>} : vector<32x8xf32>, vector<8x128xf32>, vector<32x128xf32> -> vector<32x128xf32>
    %cst_12 = arith.constant 0.000000e+00 : f32
    %8 = vector.broadcast %cst_12 : f32 to vector<32x128xf32>
    %9 = arith.maximumf %7, %8 : vector<32x128xf32>
    %cst_13 = arith.constant dense<0.000000e+00> : vector<32x128xf32>
    %10 = tpu.matmul %2, %9, %cst_13 {dimension_numbers = #tpu.dot_dimension_numbers<[1], [0], [0], [1], [0, 0, 1, 1], [], []>} : vector<32x32xf32>, vector<32x128xf32>, vector<32x128xf32> -> vector<32x128xf32>
    %11 = vector.broadcast %3 : vector<32x1xf32> to vector<32x128xf32>
    %12 = arith.addf %10, %11 : vector<32x128xf32>
    %cst_14 = arith.constant 0.000000e+00 : f32
    %13 = vector.broadcast %cst_14 : f32 to vector<32x128xf32>
    %14 = arith.maximumf %12, %13 : vector<32x128xf32>
    %15 = vector.broadcast %4 : vector<32x1xf32> to vector<32x128xf32>
    %16 = arith.mulf %14, %15 : vector<32x128xf32>
    %cst_15 = arith.constant dense<0.000000e+00> : vector<128xf32>
    %17 = vector.multi_reduction <add>, %16, %cst_15 [0] : vector<32x128xf32> to vector<128xf32>
    %18 = vector.shape_cast %17 : vector<128xf32> to vector<1x128xf32>
    %c0_16 = arith.constant 0 : index
    %c1 = arith.constant 1 : index
    %c0_17 = arith.constant 0 : index
    %c0_18 = arith.constant 0 : index
    %19 = vector.load %arg3[%c0_16, %c1, %c0_17, %c0_18] : memref<1x4x32x8xf32, #tpu.memory_space<vmem>>, vector<1x1x32x8xf32>
    %20 = vector.shape_cast %19 : vector<1x1x32x8xf32> to vector<32x8xf32>
    %cst_19 = arith.constant dense<0.000000e+00> : vector<32x128xf32>
    %21 = tpu.matmul %20, %1, %cst_19 {dimension_numbers = #tpu.dot_dimension_numbers<[1], [0], [0], [1], [0, 0, 1, 1], [], []>} : vector<32x8xf32>, vector<8x128xf32>, vector<32x128xf32> -> vector<32x128xf32>
    %cst_20 = arith.constant 0.000000e+00 : f32
    %22 = vector.broadcast %cst_20 : f32 to vector<32x128xf32>
    %23 = arith.maximumf %21, %22 : vector<32x128xf32>
    %cst_21 = arith.constant dense<0.000000e+00> : vector<32x128xf32>
    %24 = tpu.matmul %2, %23, %cst_21 {dimension_numbers = #tpu.dot_dimension_numbers<[1], [0], [0], [1], [0, 0, 1, 1], [], []>} : vector<32x32xf32>, vector<32x128xf32>, vector<32x128xf32> -> vector<32x128xf32>
    %25 = vector.broadcast %3 : vector<32x1xf32> to vector<32x128xf32>
    %26 = arith.addf %24, %25 : vector<32x128xf32>
    %cst_22 = arith.constant 0.000000e+00 : f32
    %27 = vector.broadcast %cst_22 : f32 to vector<32x128xf32>
    %28 = arith.maximumf %26, %27 : vector<32x128xf32>
    %29 = vector.broadcast %4 : vector<32x1xf32> to vector<32x128xf32>
    %30 = arith.mulf %28, %29 : vector<32x128xf32>
    %cst_23 = arith.constant dense<0.000000e+00> : vector<128xf32>
    %31 = vector.multi_reduction <add>, %30, %cst_23 [0] : vector<32x128xf32> to vector<128xf32>
    %32 = vector.shape_cast %31 : vector<128xf32> to vector<1x128xf32>
    %33 = arith.minimumf %18, %32 : vector<1x128xf32>
    %c0_24 = arith.constant 0 : index
    %c2 = arith.constant 2 : index
    %c0_25 = arith.constant 0 : index
    %c0_26 = arith.constant 0 : index
    %34 = vector.load %arg3[%c0_24, %c2, %c0_25, %c0_26] : memref<1x4x32x8xf32, #tpu.memory_space<vmem>>, vector<1x1x32x8xf32>
    %35 = vector.shape_cast %34 : vector<1x1x32x8xf32> to vector<32x8xf32>
    %cst_27 = arith.constant dense<0.000000e+00> : vector<32x128xf32>
    %36 = tpu.matmul %35, %1, %cst_27 {dimension_numbers = #tpu.dot_dimension_numbers<[1], [0], [0], [1], [0, 0, 1, 1], [], []>} : vector<32x8xf32>, vector<8x128xf32>, vector<32x128xf32> -> vector<32x128xf32>
    %cst_28 = arith.constant 0.000000e+00 : f32
    %37 = vector.broadcast %cst_28 : f32 to vector<32x128xf32>
    %38 = arith.maximumf %36, %37 : vector<32x128xf32>
    %cst_29 = arith.constant dense<0.000000e+00> : vector<32x128xf32>
    %39 = tpu.matmul %2, %38, %cst_29 {dimension_numbers = #tpu.dot_dimension_numbers<[1], [0], [0], [1], [0, 0, 1, 1], [], []>} : vector<32x32xf32>, vector<32x128xf32>, vector<32x128xf32> -> vector<32x128xf32>
    %40 = vector.broadcast %3 : vector<32x1xf32> to vector<32x128xf32>
    %41 = arith.addf %39, %40 : vector<32x128xf32>
    %cst_30 = arith.constant 0.000000e+00 : f32
    %42 = vector.broadcast %cst_30 : f32 to vector<32x128xf32>
    %43 = arith.maximumf %41, %42 : vector<32x128xf32>
    %44 = vector.broadcast %4 : vector<32x1xf32> to vector<32x128xf32>
    %45 = arith.mulf %43, %44 : vector<32x128xf32>
    %cst_31 = arith.constant dense<0.000000e+00> : vector<128xf32>
    %46 = vector.multi_reduction <add>, %45, %cst_31 [0] : vector<32x128xf32> to vector<128xf32>
    %47 = vector.shape_cast %46 : vector<128xf32> to vector<1x128xf32>
    %48 = arith.minimumf %33, %47 : vector<1x128xf32>
    %c0_32 = arith.constant 0 : index
    %c3 = arith.constant 3 : index
    %c0_33 = arith.constant 0 : index
    %c0_34 = arith.constant 0 : index
    %49 = vector.load %arg3[%c0_32, %c3, %c0_33, %c0_34] : memref<1x4x32x8xf32, #tpu.memory_space<vmem>>, vector<1x1x32x8xf32>
    %50 = vector.shape_cast %49 : vector<1x1x32x8xf32> to vector<32x8xf32>
    %cst_35 = arith.constant dense<0.000000e+00> : vector<32x128xf32>
    %51 = tpu.matmul %50, %1, %cst_35 {dimension_numbers = #tpu.dot_dimension_numbers<[1], [0], [0], [1], [0, 0, 1, 1], [], []>} : vector<32x8xf32>, vector<8x128xf32>, vector<32x128xf32> -> vector<32x128xf32>
    %cst_36 = arith.constant 0.000000e+00 : f32
    %52 = vector.broadcast %cst_36 : f32 to vector<32x128xf32>
    %53 = arith.maximumf %51, %52 : vector<32x128xf32>
    %cst_37 = arith.constant dense<0.000000e+00> : vector<32x128xf32>
    %54 = tpu.matmul %2, %53, %cst_37 {dimension_numbers = #tpu.dot_dimension_numbers<[1], [0], [0], [1], [0, 0, 1, 1], [], []>} : vector<32x32xf32>, vector<32x128xf32>, vector<32x128xf32> -> vector<32x128xf32>
    %55 = vector.broadcast %3 : vector<32x1xf32> to vector<32x128xf32>
    %56 = arith.addf %54, %55 : vector<32x128xf32>
    %cst_38 = arith.constant 0.000000e+00 : f32
    %57 = vector.broadcast %cst_38 : f32 to vector<32x128xf32>
    %58 = arith.maximumf %56, %57 : vector<32x128xf32>
    %59 = vector.broadcast %4 : vector<32x1xf32> to vector<32x128xf32>
    %60 = arith.mulf %58, %59 : vector<32x128xf32>
    %cst_39 = arith.constant dense<0.000000e+00> : vector<128xf32>
    %61 = vector.multi_reduction <add>, %60, %cst_39 [0] : vector<32x128xf32> to vector<128xf32>
    %62 = vector.shape_cast %61 : vector<128xf32> to vector<1x128xf32>
    %63 = arith.minimumf %48, %62 : vector<1x128xf32>
    %c0_40 = arith.constant 0 : index
    %64 = memref.load %arg7[%c0_40] : memref<1xf32, #tpu.memory_space<smem>>
    %65 = vector.broadcast %64 : f32 to vector<1x128xf32>
    %66 = arith.addf %63, %65 : vector<1x128xf32>
    %c0_41 = arith.constant 0 : index
    %c0_42 = arith.constant 0 : index
    %c0_43 = arith.constant 0 : index
    %67 = vector.load %arg8[%c0_41, %c0_42, %c0_43] : memref<1x1x128xf32, #tpu.memory_space<vmem>>, vector<1x1x128xf32>
    %68 = vector.shape_cast %67 : vector<1x1x128xf32> to vector<1x128xf32>
    %69 = vector.shape_cast %66 : vector<1x128xf32> to vector<1x1x128xf32>
    tpu.vector_store %arg8[%c0_41, %c0_42, %c0_43], %69 {strides = array<i32>} : memref<1x1x128xf32, #tpu.memory_space<vmem>>, vector<1x1x128xf32>,
    return
  }
  func.func @transform_0(%arg0: i32, %arg1: i32) -> (i32, i32, i32) {
    %c0_i32 = arith.constant 0 : i32
    %c0_i32_0 = arith.constant 0 : i32
    return %arg0, %c0_i32, %arg1 : i32, i32, i32
  }
  func.func @transform_1(%arg0: i32, %arg1: i32) -> (i32, i32, i32, i32) {
    %c0_i32 = arith.constant 0 : i32
    %c0_i32_0 = arith.constant 0 : i32
    %c0_i32_1 = arith.constant 0 : i32
    %c0_i32_2 = arith.constant 0 : i32
    return %arg0, %c0_i32, %c0_i32_0, %c0_i32_1 : i32, i32, i32, i32
  }
  func.func @transform_2(%arg0: i32, %arg1: i32) -> (i32, i32) {
    %c0_i32 = arith.constant 0 : i32
    %c0_i32_0 = arith.constant 0 : i32
    %c0_i32_1 = arith.constant 0 : i32
    return %c0_i32, %c0_i32_0 : i32, i32
  }
  func.func @transform_3(%arg0: i32, %arg1: i32) -> (i32, i32) {
    %c0_i32 = arith.constant 0 : i32
    %c0_i32_0 = arith.constant 0 : i32
    %c0_i32_1 = arith.constant 0 : i32
    return %c0_i32, %c0_i32_0 : i32, i32
  }
  func.func @transform_4(%arg0: i32, %arg1: i32) -> (i32, i32) {
    %c0_i32 = arith.constant 0 : i32
    %c0_i32_0 = arith.constant 0 : i32
    %c0_i32_1 = arith.constant 0 : i32
    return %c0_i32, %c0_i32_0 : i32, i32
  }
  func.func @transform_5(%arg0: i32, %arg1: i32) -> i32 {
    %c0_i32 = arith.constant 0 : i32
    %c0_i32_0 = arith.constant 0 : i32
    return %c0_i32 : i32
  }
  func.func @transform_6(%arg0: i32, %arg1: i32) -> (i32, i32, i32) {
    %c0_i32 = arith.constant 0 : i32
    %c0_i32_0 = arith.constant 0 : i32
    return %arg0, %c0_i32, %arg1 : i32, i32, i32
  }
}

</mosaic_0001>

<bundles_post_ra>
// kernel: tpu_custom_call.1
= control target key start
LH: loop header
LB: loop body
LE: loop exit
PB: predicated region body
PF: predicated region fallthrough
CT: control target
= control target key end

     0   :  { %s2025_s0 = inlined_call_operand.vmem [shape: f32[2,8,256], index: 0, kind: input, shape index: {}]   ;;  %s2026_s1 = inlined_call_operand.vmem [shape: f32[2,4,32,8], index: 1, kind: input, shape index: {}]   ;;  %s2027_s2 = inlined_call_operand.vmem [shape: f32[32,32], index: 2, kind: input, shape index: {}]   ;;  %s2028_s3 = inlined_call_operand.vmem [shape: f32[32,1], index: 3, kind: input, shape index: {}]   ;;  %s2029_s4 = inlined_call_operand.vmem [shape: f32[32,1], index: 4, kind: input, shape index: {}]   ;;  %s2030_s5 = inlined_call_operand.<no memory space> [shape: f32[1], index: 5, kind: input, shape index: {}]   ;;  %s2031_s6 = inlined_call_operand.hbm [shape: f32[2,1,256], index: 6, kind: output, shape index: {}]  }
   0x1   :  { %11 = sst [smem:[#allocation2]] %s2030_s5 }
   0x2   :  { %12 = vsyncpa [#allocation4], 0 }
   0x3   :  { %14 = vsyncpa [#allocation4 + $0x1], 0  ;;  %s1745_s23 = smov 0   ;;  %s1747_s24 = smov 0  }
   0x4   :  { %s1749_s25 = smov 0   ;;  %s1751_s26 = smov 0  }
   0x5   :  { %s1753_s27 = smov 0   ;;  %s1755_s28 = smov 0  }
   0x6   :  { %s1757_s29 = smov 0   ;;  %s1759_s30 = smov 0  }
   0x7 LB: > { %s1301_s5 = sadd.s32 4294967295, %s1703_s30   ;;  %s1302_s7 = sadd.s32 4294967294, %s1703_s30   ;;  %s1703_s30 = sphi %s1759_s30, %s20_s30   ;;  %s1699_s29 = sphi %s1757_s29, %s2040_s29   ;;  %s1695_s28 = sphi %s1755_s28, %s2039_s28   ;;  %s1691_s27 = sphi %s1753_s27, %s2038_s27   ;;  %s1687_s26 = sphi %s1751_s26, %s2037_s26   ;;  %s1683_s25 = sphi %s1749_s25, %s2036_s25   ;;  %s1679_s24 = sphi %s1747_s24, %s2035_s24   ;;  %s1675_s23 = sphi %s1745_s23, %s2034_s23  }
   0x8   : > { %s29_s8 = sadd.s32 1, %s1695_s28  ;;  %s32_s9 = sadd.s32 1, %s1699_s29 }
   0x9   : > { %p30_p0 = scmp.ge.s32.totalorder %s29_s8, 2  ;;  %p189_p1 = scmp.ne.s32.totalorder %s1683_s25, %s1679_s24 }
   0xa   : > { %p190_p2 = scmp.eq.s32.totalorder %s1301_s5, 3  ;;  %p195_p5 = scmp.ne.s32.totalorder %s1679_s24, %s1675_s23 }
   0xb   : > { %s2042_s8 = smov (%p30_p0, %s29_s8), 0  ;;  %s2044_s9 = smov (!%p30_p0, %s32_s9), %s1699_s29 }
   0xc   : > { %s175_s10 = ssub.s32 %s1695_s28, %s2042_s8  ;;  %p1796_p3 = por %p190_p2, %p189_p1 }
   0xd   : > { %p34_p4 = scmp.ge.s32.totalorder %s2044_s9, 2  ;;  %p196_p6 = scmp.eq.s32.totalorder %s1302_s7, 3 }
   0xe   : > { %p1305_p7 = scmp.ge.s32.totalorder %s1703_s30, 1  ;;  %p245_p9 = scmp.lt.s32.totalorder %s1703_s30, 5 }
   0xf   : > { %s2046_s9 = smov (%p34_p4, %s2044_s9), 0  ;;  %p1805_p8 = por %p196_p6, %p195_p5 }
  0x10   : > { %s174_s13 = ssub.s32 %s1699_s29, %s2046_s9  ;;  %s179_s14 = sadd.s32 1, %s1683_s25 }
  0x11   : > { %s176_s15 = sor.u32 %s175_s10, %s174_s13  ;;  %p246_p10 = pnand %p1305_p7, %p245_p9 }
  0x12   : > { %p177_p11 = scmp.eq.s32.totalorder %s176_s15, 0  ;;  %p282_p12 = scmp.lt.s32.totalorder (!%p246_p10), %s1691_s27, 1  ;;  %vm312_vm0 = vcmask (!%p246_p10), 64512   ;;  %v1863_v17 = vld [vmem:[%s2027_s2] sm:$0xff] (!%p246_p10)  ;;  %vm434_vm1 = vcmask (!%p246_p10), 261120   ;;  %v302_v19 = vld [vmem:[%s2028_s3 + $0x10] sm:$0xff] (!%p246_p10) }
  0x13   : > { %249 = sbr.rel (%p246_p10) target bundleno = 539 (0x21b), region = 44  ;;  %p284_p13 = scmp.lt.s32.totalorder (!%p246_p10), %s1687_s26, 1  ;;  %1427 = vmatprep.mubr.msk.f32.mxu1 (!%p246_p10), %vm434_vm1, %v1863_v17  ;;  %v300_v18 = vld [vmem:[%s2028_s3] sm:$0xff] (!%p246_p10)  ;;  %v1705_v20 = vmov (!%p246_p10), 0   ;;  %v301_v21 = vld [vmem:[%s2028_s3 + $0x8] sm:$0xff] (!%p246_p10)  ;;  %v303_v22 = vld [vmem:[%s2028_s3 + $0x18] sm:$0xff] (!%p246_p10) }
  0x14   : > { %s1814_s16 = scalar_select %p177_p11, %s1683_s25, %s179_s14  }
  0x15   : > { %1607 = vset.pattern.permute.xlu0 (!%p246_p10), %v1705_v20  ;;  %1608 = vset.pattern.permute.xlu1 (!%p246_p10), %v1705_v20  ;;  %v304_v23 = vld [vmem:[%s2029_s4] sm:$0xff] (!%p246_p10)  ;;  %v305_v24 = vld [vmem:[%s2029_s4 + $0x8] sm:$0xff] (!%p246_p10)  ;;  %v306_v25 = vld [vmem:[%s2029_s4 + $0x10] sm:$0xff] (!%p246_p10)  ;;  %s1706_s14 = smov (!%p246_p10), [#allocation3]  }
  0x16   : > { %416 = vperm.xlu0 (!%p246_p10), %1607, %v300_v18   ;;  %426 = vperm.xlu1 (!%p246_p10), %1608, %v302_v19   ;;  %v307_v26 = vld [vmem:[%s2029_s4 + $0x18] sm:$0xff] (!%p246_p10)  ;;  %v297_v41 = vld [vmem:[%s2027_s2 + $0x8] sm:$0xff] (!%p246_p10)  ;;  %v298_v44 = vld [vmem:[%s2027_s2 + $0x10] sm:$0xff] (!%p246_p10) }
  0x17   : > { %v299_v48 = vld [vmem:[%s2027_s2 + $0x18] sm:$0xff] (!%p246_p10) }
  0x1a   : > { %s283_s17 = scalar_select %p282_p12, %s1691_s27, 1  ;;  %421 = vperm.xlu0 %1607, %v301_v21   ;;  %431 = vperm.xlu1 %1608, %v303_v22  }
  0x1b   : > { %s285_s18 = scalar_select %p284_p13, %s1687_s26, 1 }
  0x1c   : > { %s1306_s19 = sshll.u32 %s283_s17, 1  ;;  %s1358_s20 = sshll.u32 %s283_s17, 7 }
  0x1d   : > { %s287_s21 = sadd.s32 %s1306_s19, %s285_s18  ;;  %s1823_s7 = scalar_lea.vmem %s2026_s1, %s1358_s20 }
  0x1e   : > { %s1307_s10 = sshll.u32 %s287_s21, 3  ;;  %v308_v0 = vld [vmem:[%s1823_s7] sm:$0xff]  ;;  %v309_v2 = vld [vmem:[%s1823_s7 + $0x8] sm:$0xff]  ;;  %v310_v3 = vld [vmem:[%s1823_s7 + $0x10] sm:$0xff]  ;;  %538 = vperm.xlu0 %1607, %v304_v23   ;;  %543 = vperm.xlu1 %1608, %v305_v24   ;;  %s1196_s17 = sld [smem:[#allocation2]] }
  0x1f   : > { %s289_s15 = scalar_lea.vmem %s2025_s0, %s1307_s10  ;;  %1413 = vmatprep.mubr.msk.f32.mxu0 %vm312_vm0, %v308_v0  ;;  %v311_v4 = vld [vmem:[%s1823_s7 + $0x18] sm:$0xff]  ;;  %v1318_v5 = vld [vmem:[%s1823_s7 + $0x20] sm:$0xff]  ;;  %v1319_v6 = vld [vmem:[%s1823_s7 + $0x28] sm:$0xff]  ;;  %s280_s18 = sand.u32 1, %s1679_s24  }
  0x20   : > { %v295_v1 = vld [vmem:[%s289_s15] sm:$0xff]  ;;  %v1320_v7 = vld [vmem:[%s1823_s7 + $0x30] sm:$0xff]  ;;  %v1321_v8 = vld [vmem:[%s1823_s7 + $0x38] sm:$0xff]  ;;  %s1354_s19 = sshll.u32 %s1691_s27, 1  ;;  %s281_s22 = scalar_lea.vmem [#allocation3], %s280_s18 }
  0x21   : > { %1411 = vmatprep.subr.mxu0 %v295_v1  ;;  %v1330_v9 = vld [vmem:[%s1823_s7 + $0x40] sm:$0xff]  ;;  %v1331_v10 = vld [vmem:[%s1823_s7 + $0x48] sm:$0xff]  ;;  %v1332_v11 = vld [vmem:[%s1823_s7 + $0x50] sm:$0xff]  ;;  %s1211_s20 = sadd.s32 %s1687_s26, %s1354_s19  ;;  %s1215_s5 = sshll.u32 %s281_s22, 4  ;;  %s1974_s5 = int_to_ptr.vmem [resolvable:$true] %s1215_s5 }
  0x22   : > { %1412 = vmatpush3.msra.mxu0 %v295_v1  ;;  %v1333_v12 = vld [vmem:[%s1823_s7 + $0x58] sm:$0xff]  ;;  %v1342_v13 = vld [vmem:[%s1823_s7 + $0x60] sm:$0xff]  ;;  %v1343_v14 = vld [vmem:[%s1823_s7 + $0x68] sm:$0xff]  ;;  %548 = vperm.xlu0 %1607, %v306_v25   ;;  %s1355_s21 = sshll.u32 %s1211_s20, 4  ;;  %s1201_s27 = scalar_lea.sflag [#allocation4], %s280_s18 }
  0x23   : > { %1414 = vmatmul.mubr.msk.f32.vlgmr.msra.gmra.mrb[0].mxu0 %vm312_vm0, %v309_v2  ;;  %1433 = vmatprep.subr.mxu0 %v295_v1  ;;  %v1344_v15 = vld [vmem:[%s1823_s7 + $0x70] sm:$0xff]  ;;  %v1345_v16 = vld [vmem:[%s1823_s7 + $0x78] sm:$0xff]  ;;  %s1972_s13 = scalar_lea.hbm %s2031_s6, %s1355_s21  ;;  %s1609_s26 = scalar_lea.vmem %s1974_s5, 16 }
  0x24   : > { %1434 = vmatpush3.msra.mxu0 %v295_v1  ;;  %1416 = vmatprep.mubr.msk.f32.mxu0 %vm312_vm0, %v310_v3  ;;  %p1610_p0 = scmp.ne.s32.totalorder %s1974_s5, %s1609_s26  ;;  %s1613_s15 = sshll.u32 %s1706_s14, 4  ;;  %s1614_s15 = int_to_ptr.vmem [resolvable:$false] %s1613_s15 }
  0x25   : > { %1455 = vmatprep.subr.mxu0 %v295_v1  ;;  %553 = vperm.xlu1 %1608, %v307_v26   ;;  %p1616_p4 = scmp.lt.s32.totalorder %s1974_s5, %s1614_s15 }
  0x26   : > { %p1611_p1 = pnand %p1610_p0, %p1796_p3 }
  0x27   : > { %1417 = vmatmul.mubr.msk.f32.gmra.mrb[2].mxu0 %vm312_vm0, %v311_v4 }
  0x28   : > { %1435 = vmatprep.mubr.msk.f32.mxu0 %vm312_vm0, %v1318_v5  ;;  %p1612_p2 = pneg %p1611_p1 }
  0x2b   : > { %1436 = vmatmul.mubr.msk.f32.vlgmr.msra.gmra.mrb[4].mxu0 %vm312_vm0, %v1319_v6 }
  0x2c   : > { %1456 = vmatpush3.msra.mxu0 %v295_v1  ;;  %1438 = vmatprep.mubr.msk.f32.mxu0 %vm312_vm0, %v1320_v7 }
  0x2d   : > { %1477 = vmatprep.subr.mxu0 %v295_v1 }
  0x2f   : > { %1439 = vmatmul.mubr.msk.f32.gmra.mrb[6].mxu0 %vm312_vm0, %v1321_v8 }
  0x30   : > { %1457 = vmatprep.mubr.msk.f32.mxu0 %vm312_vm0, %v1330_v9 }
  0x33   : > { %1458 = vmatmul.mubr.msk.f32.vlgmr.msra.gmra.mrb[8].mxu0 %vm312_vm0, %v1331_v10 }
  0x34   : > { %1478 = vmatpush3.msra.mxu0 %v295_v1  ;;  %1460 = vmatprep.mubr.msk.f32.mxu0 %vm312_vm0, %v1332_v11 }
  0x37   : > { %1461 = vmatmul.mubr.msk.f32.gmra.mrb[10].mxu0 %vm312_vm0, %v1333_v12 }
  0x38   : > { %1479 = vmatprep.mubr.msk.f32.mxu0 %vm312_vm0, %v1342_v13 }
  0x3b   : > { %1480 = vmatmul.mubr.msk.f32.vlgmr.msra.gmra.mrb[12].mxu0 %vm312_vm0, %v1343_v14 }
  0x3c   : > { %1482 = vmatprep.mubr.msk.f32.mxu0 %vm312_vm0, %v1344_v15 }
  0x3f   : > { %1483 = vmatmul.mubr.msk.f32.gmra.mrb[14].mxu0 %vm312_vm0, %v1345_v16 }
  0x40   : > { %1493 = vmatprep.mubr.msk.f32.mxu0 %vm434_vm1, %v1863_v17 }
  0x95   : > { %v1918_v6 = vpop.permute.xlu0 %416  ;;  %v1920_v7 = vpop.permute.xlu1 %426 }
  0x99   : > { %v1922_v8 = vpop.permute.xlu0 %421  ;;  %v1924_v9 = vpop.permute.xlu1 %431 }
  0x9d   : > { %v1926_v11 = vpop.permute.xlu0 %538  ;;  %v1929_v14 = vpop.permute.xlu1 %543 }
  0xa1   : > { %v1936_v25 = vpop.permute.xlu0 %548 }
  0xa4   : > { %v1938_v26 = vpop.permute.xlu1 %553 }
  0xf6   : > { %v1415_v27 = vpop.f32.mrb[0].mxu0 }
  0xf7   : > { %v411_v28 = vmax.f32 %v1415_v27, 0.0  ;;  %v391_v29 = vpop.f32.mrb[1].mxu0 }
  0xf8   : > { %v410_v30 = vmax.f32 %v391_v29, 0.0 }
  0xfa   : > { %v1418_v31 = vpop.f32.mrb[2].mxu0  ;;  %v1499_v32 = vpack.c.bf16 %v411_v28, %v410_v30 }
  0xfb   : > { %v413_v33 = vmax.f32 %v1418_v31, 0.0  ;;  %v401_v34 = vpop.f32.mrb[3].mxu0 }
  0xfc   : > { %v412_v35 = vmax.f32 %v401_v34, 0.0  ;;  %1500 = vmatprep.subr.bf16.mxu1 %v1499_v32 }
  0xfd   : > { %1502 = vmatpush3.bf16.msra.mxu1 %v1499_v32 }
  0xfe   : > { %v1503_v36 = vpack.c.bf16 %v413_v33, %v412_v35  ;;  %v1437_v37 = vpop.f32.mrb[4].mxu0 }
  0xff   : > { %v672_v38 = vmax.f32 %v1437_v37, 0.0  ;;  %v652_v39 = vpop.f32.mrb[5].mxu0 }
 0x100   : > { %v671_v40 = vmax.f32 %v652_v39, 0.0  ;;  %1504 = vmatprep.subr.bf16.mxu1 %v1503_v36 }
 0x101   : > { %1506 = vmatpush3.bf16.msra.mxu1 %v1503_v36 }
 0x102   : > { %v1507_v42 = vpack.c.bf16 %v672_v38, %v671_v40  ;;  %v1440_v43 = vpop.f32.mrb[6].mxu0 }
 0x103   : > { %v674_v45 = vmax.f32 %v1440_v43, 0.0  ;;  %v662_v46 = vpop.f32.mrb[7].mxu0 }
 0x104   : > { %v673_v47 = vmax.f32 %v662_v46, 0.0  ;;  %1428 = vmatmul.mubr.msk.f32.vlgmr.msra.gmra.mrb[0].mxu1 %vm434_vm1, %v297_v41  ;;  %1508 = vmatprep.subr.bf16.mxu1 %v1507_v42 }
 0x105   : > { %1510 = vmatpush3.bf16.msra.mxu1 %v1507_v42  ;;  %1430 = vmatprep.mubr.msk.f32.mxu1 %vm434_vm1, %v298_v44 }
 0x106   : > { %v1511_v49 = vpack.c.bf16 %v674_v45, %v673_v47  ;;  %v1459_v50 = vpop.f32.mrb[8].mxu0 }
 0x107   : > { %v881_v51 = vmax.f32 %v1459_v50, 0.0  ;;  %v861_v52 = vpop.f32.mrb[9].mxu0 }
 0x108   : > { %v880_v53 = vmax.f32 %v861_v52, 0.0  ;;  %1431 = vmatmul.mubr.msk.f32.gmra.mrb[2].mxu1 %vm434_vm1, %v299_v48  ;;  %1512 = vmatprep.subr.bf16.mxu1 %v1511_v49 }
 0x109   : > { %1514 = vmatpush3.bf16.msra.mxu1 %v1511_v49  ;;  %1449 = vmatprep.mubr.msk.f32.mxu1 %vm434_vm1, %v1863_v17 }
 0x10a   : > { %v1515_v54 = vpack.c.bf16 %v881_v51, %v880_v53  ;;  %v1462_v55 = vpop.f32.mrb[10].mxu0 }
 0x10b   : > { %v883_v56 = vmax.f32 %v1462_v55, 0.0  ;;  %v871_v57 = vpop.f32.mrb[11].mxu0 }
 0x10c   : > { %v882_v58 = vmax.f32 %v871_v57, 0.0  ;;  %1450 = vmatmul.mubr.msk.f32.vlgmr.msra.gmra.mrb[4].mxu1 %vm434_vm1, %v297_v41  ;;  %1516 = vmatprep.subr.bf16.mxu1 %v1515_v54 }
 0x10d   : > { %1518 = vmatpush3.bf16.msra.mxu1 %v1515_v54  ;;  %1452 = vmatprep.mubr.msk.f32.mxu1 %vm434_vm1, %v298_v44 }
 0x10e   : > { %v1519_v59 = vpack.c.bf16 %v883_v56, %v882_v58  ;;  %v1481_v60 = vpop.f32.mrb[12].mxu0 }
 0x10f   : > { %v1090_v61 = vmax.f32 %v1481_v60, 0.0  ;;  %v1070_v62 = vpop.f32.mrb[13].mxu0 }
 0x110   : > { %v1089_v63 = vmax.f32 %v1070_v62, 0.0  ;;  %1453 = vmatmul.mubr.msk.f32.gmra.mrb[6].mxu1 %vm434_vm1, %v299_v48  ;;  %1520 = vmatprep.subr.bf16.mxu1 %v1519_v59 }
 0x111   : > { %1522 = vmatpush3.bf16.msra.mxu1 %v1519_v59  ;;  %1471 = vmatprep.mubr.msk.f32.mxu1 %vm434_vm1, %v1863_v17 }
 0x112   : > { %v1523_v0 = vpack.c.bf16 %v1090_v61, %v1089_v63  ;;  %v1484_v1 = vpop.f32.mrb[14].mxu0 }
 0x113   : > { %v1092_v2 = vmax.f32 %v1484_v1, 0.0  ;;  %v1080_v3 = vpop.f32.mrb[15].mxu0 }
 0x114   : > { %v1091_v4 = vmax.f32 %v1080_v3, 0.0  ;;  %1472 = vmatmul.mubr.msk.f32.vlgmr.msra.gmra.mrb[8].mxu1 %vm434_vm1, %v297_v41  ;;  %1524 = vmatprep.subr.bf16.mxu0 %v1523_v0 }
 0x115   : > { %1531 = vmatprep.subr.bf16.mxu1 %v1523_v0  ;;  %1526 = vmatpush3.bf16.msra.mxu0 %v1523_v0 }
 0x116   : > { %v1527_v5 = vpack.c.bf16 %v1092_v2, %v1091_v4  ;;  %1533 = vmatpush3.bf16.msra.mxu1 %v1523_v0  ;;  %1474 = vmatprep.mubr.msk.f32.mxu1 %vm434_vm1, %v298_v44 }
 0x118   : > { %1475 = vmatmul.mubr.msk.f32.gmra.mrb[10].mxu1 %vm434_vm1, %v299_v48  ;;  %1528 = vmatprep.subr.bf16.mxu0 %v1527_v5 }
 0x119   : > { %1532 = vmatprep.subr.bf16.mxu1 %v1527_v5  ;;  %1530 = vmatpush3.bf16.msra.mxu0 %v1527_v5 }
 0x11a   : > { %1534 = vmatpush3.bf16.msra.mxu1 %v1527_v5  ;;  %1496 = vmatprep.mubr.msk.f32.mxu1 %vm434_vm1, %v298_v44 }
 0x11c   : > { %1494 = vmatmul.mubr.msk.f32.vlgmr.msra.gmra.mrb[16].mxu0 %vm434_vm1, %v297_v41 }
 0x11d   : > { %1497 = vmatmul.mubr.msk.f32.vlgmr.msra.gmra.mrb[12].mxu1 %vm434_vm1, %v299_v48 }
 0x1d7   : > { %v1429_v10 = vpop.f32.mrb[0].mxu1 }
 0x1d8   : > { %v519_v12 = vadd.f32 %v1429_v10, %v1922_v8  ;;  %v513_v13 = vpop.f32.mrb[1].mxu1 }
 0x1d9   : > { %v514_v15 = vadd.f32 %v513_v13, %v1918_v6 }
 0x1da   : > { %v533_v16 = vmax.f32 %v519_v12, 0.0 }
 0x1db   : > { %v532_v17 = vmax.f32 %v514_v15, 0.0  ;;  %v1432_v18 = vpop.f32.mrb[2].mxu1 }
 0x1dc   : > { %v529_v19 = vadd.f32 %v1432_v18, %v1924_v9  ;;  %v523_v20 = vpop.f32.mrb[3].mxu1  ;;  %v557_v21 = vmul.f32 %v1929_v14, %v533_v16 }
 0x1dd   : > { %v556_v22 = vmul.f32 %v1926_v11, %v532_v17  ;;  %v524_v23 = vadd.f32 %v523_v20, %v1920_v7 }
 0x1de   : > { %v535_v24 = vmax.f32 %v529_v19, 0.0 }
 0x1df   : > { %v534_v27 = vmax.f32 %v524_v23, 0.0  ;;  %v560_v28 = vadd.f32 %v557_v21, %v556_v22  ;;  %v1451_v29 = vpop.f32.mrb[4].mxu1 }
 0x1e0   : > { %v747_v30 = vadd.f32 %v1451_v29, %v1922_v8  ;;  %v741_v31 = vpop.f32.mrb[5].mxu1  ;;  %v559_v33 = vmul.f32 %v1938_v26, %v535_v24 }
 0x1e1   : > { %v558_v32 = vmul.f32 %v1936_v25, %v534_v27  ;;  %v742_v34 = vadd.f32 %v741_v31, %v1918_v6 }
 0x1e2   : > { %v761_v35 = vmax.f32 %v747_v30, 0.0 }
 0x1e3   : > { %v561_v36 = vadd.f32 %v560_v28, %v558_v32  ;;  %v760_v37 = vmax.f32 %v742_v34, 0.0  ;;  %v1454_v38 = vpop.f32.mrb[6].mxu1 }
 0x1e4   : > { %v765_v39 = vmul.f32 %v761_v35, %v1929_v14  ;;  %v757_v40 = vadd.f32 %v1454_v38, %v1924_v9  ;;  %v751_v41 = vpop.f32.mrb[7].mxu1 }
 0x1e5   : > { %v562_v42 = vadd.f32 %v561_v36, %v559_v33  ;;  %v764_v43 = vmul.f32 %v760_v37, %v1926_v11  ;;  %v752_v44 = vadd.f32 %v751_v41, %v1920_v7 }
 0x1e6   : > { %v763_v47 = vmax.f32 %v757_v40, 0.0 }
 0x1e7   : > { %v563_v45 = vrot.slane %v562_v42, 4  ;;  %v768_v46 = vadd.f32 %v765_v39, %v764_v43  ;;  %v762_v48 = vmax.f32 %v752_v44, 0.0  ;;  %v1473_v49 = vpop.f32.mrb[8].mxu1 }
 0x1e8   : > { %v956_v50 = vadd.f32 %v1473_v49, %v1922_v8  ;;  %v950_v51 = vpop.f32.mrb[9].mxu1  ;;  %v767_v56 = vmul.f32 %v763_v47, %v1938_v26 }
 0x1e9   : > { %v564_v52 = vadd.f32 %v563_v45, %v562_v42  ;;  %v766_v53 = vmul.f32 %v762_v48, %v1936_v25  ;;  %v951_v54 = vadd.f32 %v950_v51, %v1918_v6 }
 0x1ea   : > { %v970_v55 = vmax.f32 %v956_v50, 0.0 }
 0x1eb   : > { %v769_v57 = vadd.f32 %v768_v46, %v766_v53  ;;  %v969_v58 = vmax.f32 %v951_v54, 0.0  ;;  %v1476_v59 = vpop.f32.mrb[10].mxu1  ;;  %v565_v63 = vrot.slane %v564_v52, 2 }
 0x1ec   : > { %v974_v60 = vmul.f32 %v970_v55, %v1929_v14  ;;  %v966_v61 = vadd.f32 %v1476_v59, %v1924_v9  ;;  %v960_v62 = vpop.f32.mrb[11].mxu1 }
 0x1ed   : > { %v770_v0 = vadd.f32 %v769_v57, %v767_v56  ;;  %v973_v1 = vmul.f32 %v969_v58, %v1926_v11  ;;  %v961_v2 = vadd.f32 %v960_v62, %v1920_v7  ;;  %v566_v17 = vadd.f32 %v565_v63, %v564_v52 }
 0x1ee   : > { %v972_v5 = vmax.f32 %v966_v61, 0.0  ;;  %v1197_v52 = vstv %s1196_s17  ;;  %s1615_s17 = scalar_lea.vmem %s1614_s15, 32 }
 0x1ef   : > { %v771_v3 = vrot.slane %v770_v0, 4  ;;  %v977_v4 = vadd.f32 %v974_v60, %v973_v1  ;;  %v971_v10 = vmax.f32 %v961_v2, 0.0  ;;  %v1495_v12 = vpop.f32.mrb[16].mxu0  ;;  %v567_v32 = vrot.slane %v566_v17, 1  ;;  %p1617_p5 = scmp.lt.s32.totalorder %s1615_s17, %s1609_s26 }
 0x1f0   : > { %v1165_v13 = vadd.f32 %v1495_v12, %v1922_v8  ;;  %v1498_v15 = vpop.f32.mrb[12].mxu1  ;;  %v1159_v16 = vpop.f32.mrb[17].mxu0  ;;  %v976_v28 = vmul.f32 %v972_v5, %v1938_v26 }
 0x1f1   : > { %v772_v18 = vadd.f32 %v771_v3, %v770_v0  ;;  %v975_v19 = vmul.f32 %v971_v10, %v1936_v25  ;;  %v1169_v20 = vpop.f32.mrb[13].mxu1  ;;  %v1175_v22 = vadd.f32 %v1498_v15, %v1924_v9  ;;  %v1160_v23 = vadd.f32 %v1159_v16, %v1918_v6  ;;  %p1618_p6 = por %p1617_p5, %p1616_p4 }
 0x1f2   : > { %v1179_v21 = vmax.f32 %v1165_v13, 0.0  ;;  %v1170_v24 = vadd.f32 %v1169_v20, %v1920_v7  ;;  %v568_v7 = vadd.f32 %v567_v32, %v566_v17 }
 0x1f3   : > { %v773_v27 = vrot.slane %v772_v18, 2  ;;  %v978_v29 = vadd.f32 %v977_v4, %v975_v19  ;;  %v1178_v30 = vmax.f32 %v1160_v23, 0.0  ;;  %v1181_v35 = vmax.f32 %v1175_v22, 0.0  ;;  %p1619_p7 = pnand %p1618_p6, %p1612_p2 }
 0x1f4   : > { %v1183_v8 = vmul.f32 %v1179_v21, %v1929_v14  ;;  %v1180_v31 = vmax.f32 %v1170_v24, 0.0 }
 0x1f5   : > { %v774_v33 = vadd.f32 %v773_v27, %v772_v18  ;;  %v979_v34 = vadd.f32 %v978_v29, %v976_v28  ;;  %v1182_v36 = vmul.f32 %v1178_v30, %v1926_v11  ;;  %v1185_v14 = vmul.f32 %v1181_v35, %v1938_v26 }
 0x1f6   : > { %v1184_v6 = vmul.f32 %v1180_v31, %v1936_v25 }
 0x1f7   : > { %v775_v37 = vrot.slane %v774_v33, 1  ;;  %v980_v9 = vrot.slane %v979_v34, 4  ;;  %v1186_v38 = vadd.f32 %v1183_v8, %v1182_v36 }
 0x1f9   : > { %v776_v39 = vadd.f32 %v775_v37, %v774_v33  ;;  %v981_v40 = vadd.f32 %v980_v9, %v979_v34  ;;  %v1187_v41 = vadd.f32 %v1186_v38, %v1184_v6 }
 0x1fb   : > { %v982_v42 = vrot.slane %v981_v40, 2  ;;  %v777_v43 = vmin.f32 %v568_v7, %v776_v39  ;;  %v1188_v44 = vadd.f32 %v1187_v41, %v1185_v14 }
 0x1fd   : > { %v983_v45 = vadd.f32 %v982_v42, %v981_v40  ;;  %v1189_v46 = vrot.slane %v1188_v44, 4 }
 0x1ff   : > { %v984_v11 = vrot.slane %v983_v45, 1  ;;  %v1190_v47 = vadd.f32 %v1189_v46, %v1188_v44 }
 0x201   : > { %v985_v48 = vadd.f32 %v984_v11, %v983_v45  ;;  %v1191_v49 = vrot.slane %v1190_v47, 2 }
 0x203   : > { %v986_v25 = vmin.f32 %v777_v43, %v985_v48  ;;  %v1192_v50 = vadd.f32 %v1191_v49, %v1190_v47 }
 0x205   : > { %v1193_v51 = vrot.slane %v1192_v50, 1 }
 0x207   : > { %v1194_v26 = vadd.f32 %v1193_v51, %v1192_v50 }
 0x209   : > { %v1195_v53 = vmin.f32 %v986_v25, %v1194_v26 }
 0x20b   : > { %v1198_v54 = vadd.f32 %v1197_v52, %v1195_v53 }
 0x20d   : > { %1199 = vst [vmem:[%s281_s22] sm:$0x1] %v1198_v54 }
 0x20e   : > { %1622 = shalt.err (!%p1619_p7)
}
 0x20f   : > { %s1623_s18 = scalar_lea.hbm %s1972_s13, 16  ;;  %s1627_s21 = scalar_lea.hbm %s2031_s6, 64 }
 0x210   : > { %p1624_p9 = scmp.ne.s32.totalorder %s1972_s13, %s1623_s18  ;;  %p1628_p12 = scmp.lt.u32.totalorder %s1972_s13, %s2031_s6 }
 0x211   : > { %p1629_p13 = scmp.lt.u32.totalorder %s1627_s21, %s1623_s18  ;;  %p1631_p1 = scmp.lt.u32.totalorder %s1623_s18, %s1972_s13 }
 0x212   : > { %p1625_p10 = pnand %p1624_p9, %p1796_p3 }
 0x213   : > { %p1630_p0 = por %p1629_p13, %p1628_p12 }
 0x214   : > { %p1626_p11 = pneg %p1625_p10 }
 0x215   : > { %p1632_p2 = por %p1631_p1, %p1630_p0 }
 0x217   : > { %p1633_p4 = pnand %p1632_p2, %p1626_p11 }
 0x219   : > { %1636 = shalt.err (!%p1633_p4)
}
 0x21a   : > { %1535 = dma.vmem_to_hbm [thread:$0]  (%p1796_p3), %s1974_s5, 16, %s1972_s13, %s1201_s27  }
 0x21b PF: > { %p1541_p5 = scmp.ge.s32.totalorder %s1703_s30, 2  ;;  %s1227_s10 = sand.u32 1, %s1675_s23  }
 0x21c   : > { %s1228_s26 = scalar_lea.sflag [#allocation4], %s1227_s10 }
 0x21d   : > { %p1538_p6 = pnand %p1541_p5, %p1805_p8 }
 0x21f   : > { %1670 = dma.done.wait (!%p1538_p6), %s1228_s26, 16  }
 0x220   : > { %1672 = vsyncadd (!%p1538_p6), %s1228_s26, 4294967280  ;;  %s20_s30 = sadd.s32 1, %s1703_s30   ;;  %s2034_s23 = smov %s1679_s24 }
 0x221   : > { %p17_p7 = scmp.ge.s32.totalorder %s20_s30, 6   ;;  %s2035_s24 = smov %s1683_s25 }
 0x222   : > { %s2036_s25 = smov %s1814_s16  ;;  %s2037_s26 = smov %s1695_s28 }
 0x223   : > { %s2038_s27 = smov %s1699_s29  ;;  %s2039_s28 = smov %s2042_s8 }
 0x224   : > { %s2040_s29 = smov %s2046_s9  ;;  %19 = sbr.rel (!%p17_p7) target bundleno = 7 (0x7), region = 85 }
 0x22b   :  { %1232 = vsyncpa [#allocation4], 1 }
 0x22c   :  { %1234 = vsyncpa [#allocation4 + $0x1], 1 }

</bundles_post_ra>
